<compile_context>
chip_gen: v7x
topology: tpu7x:2x2x1
jax: 0.10.0
libtpu: 0.0.40
codegen_flags: <defaults>
</compile_context>

<pallas_src>
import jax
import jax.numpy as jnp
from jax import lax
from jax.experimental import pallas as pl
from jax.experimental.pallas import tpu as pltpu


_SMALL_C_VPU = 8          # C <= this -> VPU broadcast-FMA path (MXU would be <7% used)
_LANE_GRAIN = 256         # spatial tile granularity (lane-dense stores)
_LANE_CHUNK = 512         # in-kernel lane chunk for the VPU path (bounds vreg live-set)
_STEP_BYTES = 6 * 1024 * 1024   # ~6 MiB of HBM traffic per grid step (2 in + 1 out)
_MIN_GRID_STEPS = 8       # keep the DMA pipeline in steady state / feed both v7x cores


def _round_up(x, m):
    return -(-x // m) * m


def _vmem_limit_cap():
    """Generation-aware cap for vmem_limit_bytes."""
    try:
        phys = pltpu.get_tpu_info().vmem_capacity_bytes
    except Exception:
        phys = 64 * 1024 * 1024
    if phys <= 64 * 1024 * 1024:      # v7x-class: 64 MiB physical per TensorCore
        return 52 * 1024 * 1024       # leave headroom for Mosaic internal scratch
    return 96 * 1024 * 1024           # v5e / v6e: 128 MiB physical


def _choose_hw_tile(hw, c_eff, itemsize, n_batch_steps, act_budget):
    """Pick the lane-dense spatial tile width."""
    if hw <= _LANE_GRAIN:
        return hw
    # (a) ~_STEP_BYTES of HBM traffic per grid step (2 inputs + 1 output).
    t_target = _STEP_BYTES // (3 * c_eff * itemsize)
    # (b) double-buffered activations (2 in + 1 out, 2 buffers each) must fit VMEM.
    t_vmem = act_budget // (6 * c_eff * itemsize)
    cap = max(_LANE_GRAIN, min(t_target, t_vmem) // _LANE_GRAIN * _LANE_GRAIN)
    # (c) keep >= _MIN_GRID_STEPS total grid steps so prologue/epilogue don't dominate.
    min_splits = max(1, -(-_MIN_GRID_STEPS // max(1, n_batch_steps)))
    t_split = max(_LANE_GRAIN, _round_up(-(-hw // min_splits), _LANE_GRAIN))
    cap = min(cap, t_split)
    return hw if hw <= cap else cap


def _mxu_kernel(xr_ref, xt_ref, wr_ref, wt_ref, b_ref, o_ref):
    # xr/xt: (C, t_hw); wr/wt: (C, C); b: (C, 1); o: (C, t_hw)
    # TODO(synk): on v6e a K=2C fused dot (stack xr/xt into a (2C, t_hw) VMEM scratch)
    # would halve MXU pushes for compute-bound large-C cases; this op is HBM-bound here.
    acc = jnp.dot(wr_ref[...], xr_ref[...], preferred_element_type=jnp.float32)
    acc = acc + jnp.dot(wt_ref[...], xt_ref[...], preferred_element_type=jnp.float32)
    o_ref[...] = (acc + b_ref[...].astype(jnp.float32)).astype(o_ref.dtype)


def _make_vpu_kernel(c, g, t_hw, lane_chunk):
    """VPU broadcast-FMA kernel for tiny C; g images packed along sublanes."""
    n_full = t_hw // lane_chunk
    rem = t_hw - n_full * lane_chunk

    def _chunk(xr_ref, xt_ref, o_ref, wr, wt, b, start, width):
        xr = xr_ref[:, pl.ds(start, width)].astype(jnp.float32)
        xt = xt_ref[:, pl.ds(start, width)].astype(jnp.float32)
        rows = []
        for gi in range(g):                      # images packed along sublanes
            acc = jnp.broadcast_to(b, (c, width))
            for k in range(c):                   # static, fully unrolled (c <= 8)
                acc = acc + wr[:, k:k + 1] * xr[gi * c + k:gi * c + k + 1, :]
                acc = acc + wt[:, k:k + 1] * xt[gi * c + k:gi * c + k + 1, :]
            rows.append(acc)
        out = rows[0] if g == 1 else jnp.concatenate(rows, axis=0)
        o_ref[:, pl.ds(start, width)] = out.astype(o_ref.dtype)

    def kernel(xr_ref, xt_ref, wr_ref, wt_ref, b_ref, o_ref):
        wr = wr_ref[...].astype(jnp.float32)     # (c, c)
        wt = wt_ref[...].astype(jnp.float32)     # (c, c)
        b = b_ref[...].astype(jnp.float32)       # (c, 1): broadcasts over lanes
        if n_full == 1:
            _chunk(xr_ref, xt_ref, o_ref, wr, wt, b, 0, lane_chunk)
        elif n_full > 1:
            def body(j, carry):
                start = pl.multiple_of(j * lane_chunk, lane_chunk)
                _chunk(xr_ref, xt_ref, o_ref, wr, wt, b, start, lane_chunk)
                return carry
            lax.fori_loop(0, n_full, body, 0)
        if rem > 0:
            _chunk(xr_ref, xt_ref, o_ref, wr, wt, b, n_full * lane_chunk, rem)

    return kernel


@jax.jit
def fuse_block_complementary(rgb, t, weight, bias):
    """rgb, t: (N, C, H, W); weight: (C, 2C, 1, 1); bias: (C,). Returns (N, C, H, W)."""
    n, c, h, w = rgb.shape
    hw = h * w
    itemsize = jnp.dtype(rgb.dtype).itemsize

    # Split the 1x1-conv weight so the channel concat never materializes.
    w2 = weight[:, :, 0, 0]                      # (C, 2C)
    wr, wt = w2[:, :c], w2[:, c:]                # (C, C) each
    bcol = bias.reshape(c, 1)

    use_vpu = c <= _SMALL_C_VPU

    # Pack several images per block when C is tiny, to fill the sublanes.
    g = 1
    if use_vpu:
        sublanes = 8 if itemsize >= 4 else (16 if itemsize == 2 else 32)
        g = max(1, sublanes // c)
        while g > 1 and n % g != 0:
            g -= 1
    n_g, c_eff = n // g, g * c

    # Free (contiguous) reshapes — no HBM rewrite.
    xr = rgb.reshape(n_g, c_eff, hw)
    xt = t.reshape(n_g, c_eff, hw)

    # Resident (weight + bias) VMEM, accounting for (8,128) layout padding.
    w_tile = _round_up(c, 8) * _round_up(c, 128) * itemsize
    b_tile = _round_up(c, 8) * 128 * itemsize
    single_buffer_w = (2 * w_tile + b_tile) >= (1 << 20)   # only when it frees real VMEM
    w_bufs = 1 if single_buffer_w else 2
    resident = w_bufs * (2 * w_tile + b_tile)
    # TODO(synk): for very large C (resident weight comparable to VMEM) the output-channel
    # axis should become a third grid axis; not needed for realistic fusion-block widths.

    vmem_cap = _vmem_limit_cap()
    act_budget = max(4 * 1024 * 1024, vmem_cap - resident - 4 * 1024 * 1024)
    t_hw = _choose_hw_tile(hw, c_eff, itemsize, n_g, act_budget)
    grid = (n_g, pl.cdiv(hw, t_hw))

    est = 6 * c_eff * t_hw * itemsize + resident + 4 * 1024 * 1024
    vmem_limit = int(min(vmem_cap, max(16 * 1024 * 1024, est)))

    if single_buffer_w:
        # Constant index_map -> fetched once; single-buffer to free VMEM for bigger tiles.
        w_spec = pl.BlockSpec((c, c), lambda b, j: (0, 0), pipeline_mode=pl.Buffered(1))
        b_spec = pl.BlockSpec((c, 1), lambda b, j: (0, 0), pipeline_mode=pl.Buffered(1))
    else:
        w_spec = pl.BlockSpec((c, c), lambda b, j: (0, 0))
        b_spec = pl.BlockSpec((c, 1), lambda b, j: (0, 0))

    if use_vpu:
        lane_chunk = t_hw if t_hw <= _LANE_CHUNK else _LANE_CHUNK
        kernel = _make_vpu_kernel(c, g, t_hw, lane_chunk)
    else:
        kernel = _mxu_kernel

    x_spec = pl.BlockSpec((None, c_eff, t_hw), lambda b, j: (b, 0, j))

    out = pl.pallas_call(
        kernel,
        out_shape=jax.ShapeDtypeStruct((n_g, c_eff, hw), rgb.dtype),
        grid=grid,
        in_specs=[x_spec, x_spec, w_spec, w_spec, b_spec],
        out_specs=pl.BlockSpec((None, c_eff, t_hw), lambda b, j: (b, 0, j)),
        compiler_params=pltpu.CompilerParams(
            dimension_semantics=("parallel", "parallel"),
            vmem_limit_bytes=vmem_limit,
        ),
    )(xr, xt, wr, wt, bcol)

    return out.reshape(n, c, h, w)               # already NCHW — no transpose needed


def _reference(rgb_feature, t_feature, weight, bias):
    # Pure-VPU exact f32 reference (avoids matmul-precision ambiguity).
    x = jnp.concatenate((rgb_feature, t_feature), axis=1)         # (N, 2C, H, W)
    w2 = weight[:, :, 0, 0]                                       # (C, 2C)
    y = jnp.sum(x[:, None, :, :, :] * w2[None, :, :, None, None], axis=2)
    return y + bias.reshape(1, -1, 1, 1)


def _make_params(key, ch, dtype=jnp.float32):
    k1, k2 = jax.random.split(key)
    fan_in = 2 * ch
    bound = 1.0 / (fan_in ** 0.5)
    weight = jax.random.uniform(k1, (ch, 2 * ch, 1, 1), dtype, -bound, bound)
    bias = jax.random.uniform(k2, (ch,), dtype, -bound, bound)
    return weight, bias


if __name__ == "__main__":
    key = jax.random.PRNGKey(0)

    # --- Test 1: tiny channel count (VPU path, sublane packing) -----------------
    k1, k2, k3, key = jax.random.split(key, 4)
    N, CH, H, W = 2, 4, 16, 16
    rgb = jax.random.normal(k1, (N, CH, H, W), dtype=jnp.float32)
    t = jax.random.normal(k2, (N, CH, H, W), dtype=jnp.float32)
    weight, bias = _make_params(k3, CH)

    out = jax.block_until_ready(fuse_block_complementary(rgb, t, weight, bias))
    ref = _reference(rgb, t, weight, bias)
    assert out.shape == (N, CH, H, W)
    assert jnp.allclose(out, ref, atol=1e-5, rtol=1e-5), "VPU-path mismatch vs reference"

    # --- Test 2: MXU path with a ragged last spatial tile ------------------------
    k1, k2, k3, key = jax.random.split(key, 4)
    N2, CH2, H2, W2 = 2, 32, 20, 20            # hw = 400 -> ragged 256-wide tiles
    rgb2 = jax.random.normal(k1, (N2, CH2, H2, W2), dtype=jnp.float32)
    t2 = jax.random.normal(k2, (N2, CH2, H2, W2), dtype=jnp.float32)
    weight2, bias2 = _make_params(k3, CH2)

    out2 = jax.block_until_ready(fuse_block_complementary(rgb2, t2, weight2, bias2))
    ref2 = _reference(rgb2, t2, weight2, bias2)
    assert out2.shape == (N2, CH2, H2, W2)
    # MXU f32 matmul may use reduced-precision passes -> slightly looser tolerance.
    assert jnp.allclose(out2, ref2, atol=1e-3, rtol=1e-3), "MXU-path mismatch vs reference"

    print("KERNEL_OK")
</pallas_src>

<mosaic_0001>
module attributes {stable_mosaic.version = 11 : i64} {
  func.func @kernel(%arg0: i32, %arg1: i32, %arg2: memref<1x8x256xf32, #tpu.memory_space<vmem>>, %arg3: memref<1x8x256xf32, #tpu.memory_space<vmem>>, %arg4: memref<4x4xf32, #tpu.memory_space<vmem>>, %arg5: memref<4x4xf32, #tpu.memory_space<vmem>>, %arg6: memref<4x1xf32, #tpu.memory_space<vmem>>, %arg7: memref<1x8x256xf32, #tpu.memory_space<vmem>>) attributes {dimension_semantics = [#tpu.dimension_semantics<parallel>, #tpu.dimension_semantics<parallel>], iteration_bounds = array<i64: 1, 1>, scalar_prefetch = 0 : i64, scratch_operands = 0 : i64, tpu.core_type = #tpu.core_type<tc>, window_params = [{transform_indices = @transform_0, window_bounds = array<i64: 1, 8, 256>}, {transform_indices = @transform_1, window_bounds = array<i64: 1, 8, 256>}, {pipeline_mode = #tpu.pipeline_mode<synchronous>, transform_indices = @transform_2, window_bounds = array<i64: 4, 4>}, {pipeline_mode = #tpu.pipeline_mode<synchronous>, transform_indices = @transform_3, window_bounds = array<i64: 4, 4>}, {pipeline_mode = #tpu.pipeline_mode<synchronous>, transform_indices = @transform_4, window_bounds = array<i64: 4, 1>}, {transform_indices = @transform_5, window_bounds = array<i64: 1, 8, 256>}]} {
    %c0 = arith.constant 0 : index
    %c0_0 = arith.constant 0 : index
    %0 = vector.load %arg4[%c0, %c0_0] : memref<4x4xf32, #tpu.memory_space<vmem>>, vector<4x4xf32>
    %c0_1 = arith.constant 0 : index
    %c0_2 = arith.constant 0 : index
    %1 = vector.load %arg5[%c0_1, %c0_2] : memref<4x4xf32, #tpu.memory_space<vmem>>, vector<4x4xf32>
    %c0_3 = arith.constant 0 : index
    %c0_4 = arith.constant 0 : index
    %2 = vector.load %arg6[%c0_3, %c0_4] : memref<4x1xf32, #tpu.memory_space<vmem>>, vector<4x1xf32>
    %c0_5 = arith.constant 0 : index
    %c0_6 = arith.constant 0 : index
    %c0_7 = arith.constant 0 : index
    %3 = vector.load %arg2[%c0_5, %c0_6, %c0_7] : memref<1x8x256xf32, #tpu.memory_space<vmem>>, vector<1x8x256xf32>
    %4 = vector.shape_cast %3 : vector<1x8x256xf32> to vector<8x256xf32>
    %c0_8 = arith.constant 0 : index
    %c0_9 = arith.constant 0 : index
    %c0_10 = arith.constant 0 : index
    %5 = vector.load %arg3[%c0_8, %c0_9, %c0_10] : memref<1x8x256xf32, #tpu.memory_space<vmem>>, vector<1x8x256xf32>
    %6 = vector.shape_cast %5 : vector<1x8x256xf32> to vector<8x256xf32>
    %7 = vector.shape_cast %2 : vector<4x1xf32> to vector<4x1xf32>
    %8 = vector.broadcast %7 : vector<4x1xf32> to vector<4x256xf32>
    %9 = vector.extract_strided_slice %0 {offsets = [0, 0], sizes = [4, 1], strides = [1, 1]} : vector<4x4xf32> to vector<4x1xf32>
    %10 = vector.extract_strided_slice %4 {offsets = [0, 0], sizes = [1, 256], strides = [1, 1]} : vector<8x256xf32> to vector<1x256xf32>
    %11 = vector.broadcast %9 : vector<4x1xf32> to vector<4x256xf32>
    %12 = vector.broadcast %10 : vector<1x256xf32> to vector<4x256xf32>
    %13 = arith.mulf %11, %12 : vector<4x256xf32>
    %14 = arith.addf %8, %13 : vector<4x256xf32>
    %15 = vector.extract_strided_slice %1 {offsets = [0, 0], sizes = [4, 1], strides = [1, 1]} : vector<4x4xf32> to vector<4x1xf32>
    %16 = vector.extract_strided_slice %6 {offsets = [0, 0], sizes = [1, 256], strides = [1, 1]} : vector<8x256xf32> to vector<1x256xf32>
    %17 = vector.broadcast %15 : vector<4x1xf32> to vector<4x256xf32>
    %18 = vector.broadcast %16 : vector<1x256xf32> to vector<4x256xf32>
    %19 = arith.mulf %17, %18 : vector<4x256xf32>
    %20 = arith.addf %14, %19 : vector<4x256xf32>
    %21 = vector.extract_strided_slice %0 {offsets = [0, 1], sizes = [4, 1], strides = [1, 1]} : vector<4x4xf32> to vector<4x1xf32>
    %22 = vector.extract_strided_slice %4 {offsets = [1, 0], sizes = [1, 256], strides = [1, 1]} : vector<8x256xf32> to vector<1x256xf32>
    %23 = vector.broadcast %21 : vector<4x1xf32> to vector<4x256xf32>
    %24 = vector.broadcast %22 : vector<1x256xf32> to vector<4x256xf32>
    %25 = arith.mulf %23, %24 : vector<4x256xf32>
    %26 = arith.addf %20, %25 : vector<4x256xf32>
    %27 = vector.extract_strided_slice %1 {offsets = [0, 1], sizes = [4, 1], strides = [1, 1]} : vector<4x4xf32> to vector<4x1xf32>
    %28 = vector.extract_strided_slice %6 {offsets = [1, 0], sizes = [1, 256], strides = [1, 1]} : vector<8x256xf32> to vector<1x256xf32>
    %29 = vector.broadcast %27 : vector<4x1xf32> to vector<4x256xf32>
    %30 = vector.broadcast %28 : vector<1x256xf32> to vector<4x256xf32>
    %31 = arith.mulf %29, %30 : vector<4x256xf32>
    %32 = arith.addf %26, %31 : vector<4x256xf32>
    %33 = vector.extract_strided_slice %0 {offsets = [0, 2], sizes = [4, 1], strides = [1, 1]} : vector<4x4xf32> to vector<4x1xf32>
    %34 = vector.extract_strided_slice %4 {offsets = [2, 0], sizes = [1, 256], strides = [1, 1]} : vector<8x256xf32> to vector<1x256xf32>
    %35 = vector.broadcast %33 : vector<4x1xf32> to vector<4x256xf32>
    %36 = vector.broadcast %34 : vector<1x256xf32> to vector<4x256xf32>
    %37 = arith.mulf %35, %36 : vector<4x256xf32>
    %38 = arith.addf %32, %37 : vector<4x256xf32>
    %39 = vector.extract_strided_slice %1 {offsets = [0, 2], sizes = [4, 1], strides = [1, 1]} : vector<4x4xf32> to vector<4x1xf32>
    %40 = vector.extract_strided_slice %6 {offsets = [2, 0], sizes = [1, 256], strides = [1, 1]} : vector<8x256xf32> to vector<1x256xf32>
    %41 = vector.broadcast %39 : vector<4x1xf32> to vector<4x256xf32>
    %42 = vector.broadcast %40 : vector<1x256xf32> to vector<4x256xf32>
    %43 = arith.mulf %41, %42 : vector<4x256xf32>
    %44 = arith.addf %38, %43 : vector<4x256xf32>
    %45 = vector.extract_strided_slice %0 {offsets = [0, 3], sizes = [4, 1], strides = [1, 1]} : vector<4x4xf32> to vector<4x1xf32>
    %46 = vector.extract_strided_slice %4 {offsets = [3, 0], sizes = [1, 256], strides = [1, 1]} : vector<8x256xf32> to vector<1x256xf32>
    %47 = vector.broadcast %45 : vector<4x1xf32> to vector<4x256xf32>
    %48 = vector.broadcast %46 : vector<1x256xf32> to vector<4x256xf32>
    %49 = arith.mulf %47, %48 : vector<4x256xf32>
    %50 = arith.addf %44, %49 : vector<4x256xf32>
    %51 = vector.extract_strided_slice %1 {offsets = [0, 3], sizes = [4, 1], strides = [1, 1]} : vector<4x4xf32> to vector<4x1xf32>
    %52 = vector.extract_strided_slice %6 {offsets = [3, 0], sizes = [1, 256], strides = [1, 1]} : vector<8x256xf32> to vector<1x256xf32>
    %53 = vector.broadcast %51 : vector<4x1xf32> to vector<4x256xf32>
    %54 = vector.broadcast %52 : vector<1x256xf32> to vector<4x256xf32>
    %55 = arith.mulf %53, %54 : vector<4x256xf32>
    %56 = arith.addf %50, %55 : vector<4x256xf32>
    %57 = vector.shape_cast %2 : vector<4x1xf32> to vector<4x1xf32>
    %58 = vector.broadcast %57 : vector<4x1xf32> to vector<4x256xf32>
    %59 = vector.extract_strided_slice %0 {offsets = [0, 0], sizes = [4, 1], strides = [1, 1]} : vector<4x4xf32> to vector<4x1xf32>
    %60 = vector.extract_strided_slice %4 {offsets = [4, 0], sizes = [1, 256], strides = [1, 1]} : vector<8x256xf32> to vector<1x256xf32>
    %61 = vector.broadcast %59 : vector<4x1xf32> to vector<4x256xf32>
    %62 = vector.broadcast %60 : vector<1x256xf32> to vector<4x256xf32>
    %63 = arith.mulf %61, %62 : vector<4x256xf32>
    %64 = arith.addf %58, %63 : vector<4x256xf32>
    %65 = vector.extract_strided_slice %1 {offsets = [0, 0], sizes = [4, 1], strides = [1, 1]} : vector<4x4xf32> to vector<4x1xf32>
    %66 = vector.extract_strided_slice %6 {offsets = [4, 0], sizes = [1, 256], strides = [1, 1]} : vector<8x256xf32> to vector<1x256xf32>
    %67 = vector.broadcast %65 : vector<4x1xf32> to vector<4x256xf32>
    %68 = vector.broadcast %66 : vector<1x256xf32> to vector<4x256xf32>
    %69 = arith.mulf %67, %68 : vector<4x256xf32>
    %70 = arith.addf %64, %69 : vector<4x256xf32>
    %71 = vector.extract_strided_slice %0 {offsets = [0, 1], sizes = [4, 1], strides = [1, 1]} : vector<4x4xf32> to vector<4x1xf32>
    %72 = vector.extract_strided_slice %4 {offsets = [5, 0], sizes = [1, 256], strides = [1, 1]} : vector<8x256xf32> to vector<1x256xf32>
    %73 = vector.broadcast %71 : vector<4x1xf32> to vector<4x256xf32>
    %74 = vector.broadcast %72 : vector<1x256xf32> to vector<4x256xf32>
    %75 = arith.mulf %73, %74 : vector<4x256xf32>
    %76 = arith.addf %70, %75 : vector<4x256xf32>
    %77 = vector.extract_strided_slice %1 {offsets = [0, 1], sizes = [4, 1], strides = [1, 1]} : vector<4x4xf32> to vector<4x1xf32>
    %78 = vector.extract_strided_slice %6 {offsets = [5, 0], sizes = [1, 256], strides = [1, 1]} : vector<8x256xf32> to vector<1x256xf32>
    %79 = vector.broadcast %77 : vector<4x1xf32> to vector<4x256xf32>
    %80 = vector.broadcast %78 : vector<1x256xf32> to vector<4x256xf32>
    %81 = arith.mulf %79, %80 : vector<4x256xf32>
    %82 = arith.addf %76, %81 : vector<4x256xf32>
    %83 = vector.extract_strided_slice %0 {offsets = [0, 2], sizes = [4, 1], strides = [1, 1]} : vector<4x4xf32> to vector<4x1xf32>
    %84 = vector.extract_strided_slice %4 {offsets = [6, 0], sizes = [1, 256], strides = [1, 1]} : vector<8x256xf32> to vector<1x256xf32>
    %85 = vector.broadcast %83 : vector<4x1xf32> to vector<4x256xf32>
    %86 = vector.broadcast %84 : vector<1x256xf32> to vector<4x256xf32>
    %87 = arith.mulf %85, %86 : vector<4x256xf32>
    %88 = arith.addf %82, %87 : vector<4x256xf32>
    %89 = vector.extract_strided_slice %1 {offsets = [0, 2], sizes = [4, 1], strides = [1, 1]} : vector<4x4xf32> to vector<4x1xf32>
    %90 = vector.extract_strided_slice %6 {offsets = [6, 0], sizes = [1, 256], strides = [1, 1]} : vector<8x256xf32> to vector<1x256xf32>
    %91 = vector.broadcast %89 : vector<4x1xf32> to vector<4x256xf32>
    %92 = vector.broadcast %90 : vector<1x256xf32> to vector<4x256xf32>
    %93 = arith.mulf %91, %92 : vector<4x256xf32>
    %94 = arith.addf %88, %93 : vector<4x256xf32>
    %95 = vector.extract_strided_slice %0 {offsets = [0, 3], sizes = [4, 1], strides = [1, 1]} : vector<4x4xf32> to vector<4x1xf32>
    %96 = vector.extract_strided_slice %4 {offsets = [7, 0], sizes = [1, 256], strides = [1, 1]} : vector<8x256xf32> to vector<1x256xf32>
    %97 = vector.broadcast %95 : vector<4x1xf32> to vector<4x256xf32>
    %98 = vector.broadcast %96 : vector<1x256xf32> to vector<4x256xf32>
    %99 = arith.mulf %97, %98 : vector<4x256xf32>
    %100 = arith.addf %94, %99 : vector<4x256xf32>
    %101 = vector.extract_strided_slice %1 {offsets = [0, 3], sizes = [4, 1], strides = [1, 1]} : vector<4x4xf32> to vector<4x1xf32>
    %102 = vector.extract_strided_slice %6 {offsets = [7, 0], sizes = [1, 256], strides = [1, 1]} : vector<8x256xf32> to vector<1x256xf32>
    %103 = vector.broadcast %101 : vector<4x1xf32> to vector<4x256xf32>
    %104 = vector.broadcast %102 : vector<1x256xf32> to vector<4x256xf32>
    %105 = arith.mulf %103, %104 : vector<4x256xf32>
    %106 = arith.addf %100, %105 : vector<4x256xf32>
    %107 = tpu.concatenate %56, %106 in 0 : vector<4x256xf32>, vector<4x256xf32> -> vector<8x256xf32>
    %c0_11 = arith.constant 0 : index
    %c0_12 = arith.constant 0 : index
    %c0_13 = arith.constant 0 : index
    %108 = vector.load %arg7[%c0_11, %c0_12, %c0_13] : memref<1x8x256xf32, #tpu.memory_space<vmem>>, vector<1x8x256xf32>
    %109 = vector.shape_cast %108 : vector<1x8x256xf32> to vector<8x256xf32>
    %110 = vector.shape_cast %107 : vector<8x256xf32> to vector<1x8x256xf32>
    tpu.vector_store %arg7[%c0_11, %c0_12, %c0_13], %110 {strides = array<i32>} : memref<1x8x256xf32, #tpu.memory_space<vmem>>, vector<1x8x256xf32>,
    return
  }
  func.func @transform_0(%arg0: i32, %arg1: i32) -> (i32, i32, i32) {
    %c0_i32 = arith.constant 0 : i32
    %c0_i32_0 = arith.constant 0 : i32
    return %arg0, %c0_i32, %arg1 : i32, i32, i32
  }
  func.func @transform_1(%arg0: i32, %arg1: i32) -> (i32, i32, i32) {
    %c0_i32 = arith.constant 0 : i32
    %c0_i32_0 = arith.constant 0 : i32
    return %arg0, %c0_i32, %arg1 : i32, i32, i32
  }
  func.func @transform_2(%arg0: i32, %arg1: i32) -> (i32, i32) {
    %c0_i32 = arith.constant 0 : i32
    %c0_i32_0 = arith.constant 0 : i32
    %c0_i32_1 = arith.constant 0 : i32
    return %c0_i32, %c0_i32_0 : i32, i32
  }
  func.func @transform_3(%arg0: i32, %arg1: i32) -> (i32, i32) {
    %c0_i32 = arith.constant 0 : i32
    %c0_i32_0 = arith.constant 0 : i32
    %c0_i32_1 = arith.constant 0 : i32
    return %c0_i32, %c0_i32_0 : i32, i32
  }
  func.func @transform_4(%arg0: i32, %arg1: i32) -> (i32, i32) {
    %c0_i32 = arith.constant 0 : i32
    %c0_i32_0 = arith.constant 0 : i32
    %c0_i32_1 = arith.constant 0 : i32
    return %c0_i32, %c0_i32_0 : i32, i32
  }
  func.func @transform_5(%arg0: i32, %arg1: i32) -> (i32, i32, i32) {
    %c0_i32 = arith.constant 0 : i32
    %c0_i32_0 = arith.constant 0 : i32
    return %arg0, %c0_i32, %arg1 : i32, i32, i32
  }
}

</mosaic_0001>

<bundles_post_ra>
// kernel: fuse_block_complementary.1
= control target key start
LH: loop header
LB: loop body
LE: loop exit
PB: predicated region body
PF: predicated region fallthrough
CT: control target
= control target key end

     0   :  { %v284_v0 = vmov 0   ;;  %v285_v4 = vmov 1   ;;  %v286_v5 = vmov 2   ;;  %v287_v6 = vmov 3   ;;  %s421_s3 = inlined_call_operand.vmem [shape: f32[4,4], index: 3, kind: input, shape index: {}]   ;;  %s422_s2 = inlined_call_operand.vmem [shape: f32[4,4], index: 2, kind: input, shape index: {}]   ;;  %s423_s4 = inlined_call_operand.vmem [shape: f32[4,1], index: 4, kind: input, shape index: {}]   ;;  %s424_s1 = inlined_call_operand.vmem [shape: f32[1,8,256], index: 1, kind: input, shape index: {}]   ;;  %s425_s0 = inlined_call_operand.vmem [shape: f32[1,8,256], index: 0, kind: input, shape index: {}]   ;;  %s426_s5 = inlined_call_operand.vmem [shape: f32[1,8,256], index: 5, kind: output, shape index: {}]  }
   0x1   :  { %278 = vset.pattern.permute.xlu1 %v284_v0  ;;  %277 = vset.pattern.permute.xlu0 %v284_v0  ;;  %v21_v1 = vld [vmem:[%s421_s3] sm:$0xf]  ;;  %v37_v7 = vlaneseq  ;;  %v335_v12 = vld [vmem:[%s424_s1 + $0x8] sm:$0xff]  ;;  %vm264_vm0 = vcmask 1043456  }
   0x2   :  { %v20_v2 = vld [vmem:[%s422_s2] sm:$0xf]  ;;  %51 = vperm.xlu1 %278, %v21_v1   ;;  %v345_v14 = vld [vmem:[%s425_s0 + $0x8] sm:$0xff] }
   0x3   :  { %34 = vperm.xlu0 %277, %v20_v2   ;;  %v22_v3 = vld [vmem:[%s423_s4] sm:$0xf]  ;;  %v38_v8 = vshrl.u32 %v37_v7, 7 }
   0x4   :  { %v330_v11 = vld [vmem:[%s424_s1] sm:$0xff] }
   0x5   :  { %v39_v9 = vsub.s32 0, %v38_v8  ;;  %v164_v10 = vsub.s32 4, %v38_v8  ;;  %v340_v13 = vld [vmem:[%s425_s0] sm:$0xff]  ;;  %v347_v15 = vsub.s32 1, %v38_v8  ;;  %v349_v16 = vsub.s32 5, %v38_v8 }
   0x6   :  { %279 = vset.pattern.permute.xlu1 %v285_v4  ;;  %v354_v20 = vsub.s32 2, %v38_v8  ;;  %v359_v24 = vsub.s32 6, %v38_v8  ;;  %v395_v49 = vsub.s32 3, %v38_v8  ;;  %v397_v50 = vsub.s32 7, %v38_v8 }
   0x7   :  { %29 = vperm.xlu0 %277, %v22_v3   ;;  %67 = vperm.xlu1 %279, %v20_v2   ;;  %v57_v17 = vrot.slane %v330_v11, %v39_v9  ;;  %v61_v18 = vrot.slane %v335_v12, %v39_v9  ;;  %v177_v19 = vrot.slane %v330_v11, %v164_v10 }
   0x8   :  { %v181_v21 = vrot.slane %v335_v12, %v164_v10  ;;  %v40_v22 = vrot.slane %v340_v13, %v39_v9  ;;  %v44_v23 = vrot.slane %v345_v14, %v39_v9  ;;  %v165_v25 = vrot.slane %v340_v13, %v164_v10 }
   0x9   :  { %v169_v26 = vrot.slane %v345_v14, %v164_v10  ;;  %v73_v27 = vrot.slane %v340_v13, %v347_v15  ;;  %v77_v28 = vrot.slane %v345_v14, %v347_v15  ;;  %v189_v29 = vrot.slane %v340_v13, %v349_v16 }
   0xa   :  { %v193_v30 = vrot.slane %v345_v14, %v349_v16  ;;  %v89_v31 = vrot.slane %v330_v11, %v347_v15  ;;  %v93_v32 = vrot.slane %v335_v12, %v347_v15  ;;  %v201_v35 = vrot.slane %v330_v11, %v349_v16 }
   0xb   :  { %280 = vset.pattern.permute.xlu0 %v285_v4  ;;  %281 = vset.pattern.permute.xlu1 %v286_v5  ;;  %v205_v36 = vrot.slane %v335_v12, %v349_v16  ;;  %v105_v37 = vrot.slane %v340_v13, %v354_v20  ;;  %v109_v38 = vrot.slane %v345_v14, %v354_v20 }
   0xc   :  { %83 = vperm.xlu0 %280, %v21_v1   ;;  %99 = vperm.xlu1 %281, %v20_v2   ;;  %v213_v39 = vrot.slane %v340_v13, %v359_v24  ;;  %v217_v40 = vrot.slane %v345_v14, %v359_v24  ;;  %v121_v41 = vrot.slane %v330_v11, %v354_v20 }
   0xd   :  { %v125_v42 = vrot.slane %v335_v12, %v354_v20  ;;  %v225_v47 = vrot.slane %v330_v11, %v359_v24  ;;  %v229_v48 = vrot.slane %v335_v12, %v359_v24  ;;  %v137_v5 = vrot.slane %v340_v13, %v395_v49 }
   0xe   :  { %v237_v7 = vrot.slane %v340_v13, %v397_v50  ;;  %v241_v8 = vrot.slane %v345_v14, %v397_v50 }
  0x10   :  { %282 = vset.pattern.permute.xlu0 %v287_v6  ;;  %115 = vperm.xlu1 %281, %v21_v1  }
  0x11   :  { %131 = vperm.xlu0 %282, %v20_v2  }
  0x14   :  { %283 = vset.pattern.permute.xlu1 %v287_v6  ;;  %v141_v6 = vrot.slane %v345_v14, %v395_v49  ;;  %v153_v14 = vrot.slane %v330_v11, %v395_v49 }
  0x15   :  { %147 = vperm.xlu1 %283, %v21_v1  }
  0x81   :  { %v52_v33 = vpop.permute.xlu1 %51 }
  0x82   :  { %v35_v34 = vpop.permute.xlu0 %34  ;;  %v62_v51 = vmul.f32 %v57_v17, %v52_v33  ;;  %v63_v52 = vmul.f32 %v61_v18, %v52_v33  ;;  %v182_v53 = vmul.f32 %v177_v19, %v52_v33  ;;  %v183_v54 = vmul.f32 %v181_v21, %v52_v33 }
  0x83   :  { %v45_v43 = vmul.f32 %v40_v22, %v35_v34  ;;  %v46_v44 = vmul.f32 %v44_v23, %v35_v34  ;;  %v170_v45 = vmul.f32 %v165_v25, %v35_v34  ;;  %v171_v46 = vmul.f32 %v169_v26, %v35_v34 }
  0x86   :  { %v30_v55 = vpop.permute.xlu0 %29  ;;  %v68_v60 = vpop.permute.xlu1 %67 }
  0x87   :  { %v47_v56 = vadd.f32 %v45_v43, %v30_v55  ;;  %v48_v57 = vadd.f32 %v46_v44, %v30_v55  ;;  %v172_v58 = vadd.f32 %v170_v45, %v30_v55  ;;  %v173_v59 = vadd.f32 %v171_v46, %v30_v55 }
  0x88   :  { %v78_v61 = vmul.f32 %v73_v27, %v68_v60  ;;  %v79_v62 = vmul.f32 %v77_v28, %v68_v60  ;;  %v194_v63 = vmul.f32 %v189_v29, %v68_v60  ;;  %v195_v0 = vmul.f32 %v193_v30, %v68_v60 }
  0x89   :  { %v64_v1 = vadd.f32 %v62_v51, %v47_v56  ;;  %v65_v2 = vadd.f32 %v63_v52, %v48_v57  ;;  %v184_v3 = vadd.f32 %v182_v53, %v172_v58  ;;  %v185_v4 = vadd.f32 %v183_v54, %v173_v59 }
  0x8a   :  { %v157_v30 = vrot.slane %v335_v12, %v395_v49 }
  0x8b   :  { %v80_v9 = vadd.f32 %v78_v61, %v64_v1  ;;  %v81_v10 = vadd.f32 %v79_v62, %v65_v2  ;;  %v196_v15 = vadd.f32 %v194_v63, %v184_v3  ;;  %v197_v16 = vadd.f32 %v195_v0, %v185_v4  ;;  %v84_v17 = vpop.permute.xlu0 %83  ;;  %v100_v22 = vpop.permute.xlu1 %99 }
  0x8c   :  { %v94_v18 = vmul.f32 %v89_v31, %v84_v17  ;;  %v95_v19 = vmul.f32 %v93_v32, %v84_v17  ;;  %v206_v20 = vmul.f32 %v201_v35, %v84_v17  ;;  %v207_v21 = vmul.f32 %v205_v36, %v84_v17 }
  0x8d   :  { %v110_v23 = vmul.f32 %v105_v37, %v100_v22  ;;  %v111_v24 = vmul.f32 %v109_v38, %v100_v22  ;;  %v218_v25 = vmul.f32 %v213_v39, %v100_v22  ;;  %v219_v26 = vmul.f32 %v217_v40, %v100_v22 }
  0x8e   :  { %v96_v27 = vadd.f32 %v94_v18, %v80_v9  ;;  %v97_v28 = vadd.f32 %v95_v19, %v81_v10  ;;  %v208_v13 = vadd.f32 %v206_v20, %v196_v15  ;;  %v209_v29 = vadd.f32 %v207_v21, %v197_v16 }
  0x8f   :  { %v249_v31 = vrot.slane %v330_v11, %v397_v50  ;;  %v253_v32 = vrot.slane %v335_v12, %v397_v50  ;;  %v116_v37 = vpop.permute.xlu1 %115 }
  0x90   :  { %v112_v33 = vadd.f32 %v110_v23, %v96_v27  ;;  %v113_v34 = vadd.f32 %v111_v24, %v97_v28  ;;  %v220_v35 = vadd.f32 %v218_v25, %v208_v13  ;;  %v221_v36 = vadd.f32 %v219_v26, %v209_v29  ;;  %v132_v38 = vpop.permute.xlu0 %131 }
  0x91   :  { %v126_v39 = vmul.f32 %v121_v41, %v116_v37  ;;  %v127_v40 = vmul.f32 %v125_v42, %v116_v37  ;;  %v230_v43 = vmul.f32 %v225_v47, %v116_v37  ;;  %v231_v44 = vmul.f32 %v229_v48, %v116_v37 }
  0x92   :  { %v142_v45 = vmul.f32 %v137_v5, %v132_v38  ;;  %v143_v46 = vmul.f32 %v141_v6, %v132_v38  ;;  %v242_v51 = vmul.f32 %v237_v7, %v132_v38  ;;  %v243_v49 = vmul.f32 %v241_v8, %v132_v38 }
  0x93   :  { %v128_v52 = vadd.f32 %v126_v39, %v112_v33  ;;  %v129_v53 = vadd.f32 %v127_v40, %v113_v34  ;;  %v232_v11 = vadd.f32 %v230_v43, %v220_v35  ;;  %v233_v54 = vadd.f32 %v231_v44, %v221_v36 }
  0x94   :  { %v148_v57 = vpop.permute.xlu1 %147 }
  0x95   :  { %v144_v55 = vadd.f32 %v142_v45, %v128_v52  ;;  %v145_v12 = vadd.f32 %v143_v46, %v129_v53  ;;  %v244_v50 = vadd.f32 %v242_v51, %v232_v11  ;;  %v245_v56 = vadd.f32 %v243_v49, %v233_v54 }
  0x96   :  { %v158_v58 = vmul.f32 %v153_v14, %v148_v57  ;;  %v159_v59 = vmul.f32 %v157_v30, %v148_v57  ;;  %v254_v60 = vmul.f32 %v249_v31, %v148_v57  ;;  %v255_v41 = vmul.f32 %v253_v32, %v148_v57 }
  0x98   :  { %v256_v42 = vadd.f32 %v254_v60, %v244_v50  ;;  %v257_v47 = vadd.f32 %v255_v41, %v245_v56  ;;  %v160_v48 = vadd.f32 %v158_v58, %v144_v55  ;;  %v161_v61 = vadd.f32 %v159_v59, %v145_v12 }
  0x9a   :  { %v260_v62 = vrot.slane %v256_v42, 4  ;;  %v261_v63 = vrot.slane %v257_v47, 4 }
  0x9c   :  { %v265_v0 = vsel %vm264_vm0, %v160_v48, %v260_v62  ;;  %v266_v1 = vsel %vm264_vm0, %v161_v61, %v261_v63 }
  0x9d   :  { %267 = vst [vmem:[%s426_s5] sm:$0xff] %v265_v0  ;;  %268 = vst [vmem:[%s426_s5 + $0x8] sm:$0xff] %v266_v1 }

</bundles_post_ra>
